<compile_context>
chip_gen: v6e
topology: v6e:2x2x1
jax: 0.10.0
libtpu: 0.0.40
codegen_flags: <defaults>
</compile_context>

<pallas_src>
import jax
import jax.numpy as jnp
from jax.experimental import pallas as pl
from jax.experimental.pallas import tpu as pltpu

_LANE = 128
_BLOCK_BYTES = 2 * 1024 * 1024     # per-block budget for single-array copies
_SMALL_BYTES = 512 * 1024          # below this: one full-extent block is fine


# ---------------------------------------------------------------------------
# Kernels (pure identity copies)
# ---------------------------------------------------------------------------
def _copy1_kernel(x_ref, o_ref):
    o_ref[...] = x_ref[...]


def _copy2_kernel(a_ref, b_ref, oa_ref, ob_ref):
    oa_ref[...] = a_ref[...]
    ob_ref[...] = b_ref[...]


# ---------------------------------------------------------------------------
# Tiling helpers
# ---------------------------------------------------------------------------
def _lane_dense_2d(x: jax.Array):
    """Reshape to (rows, cols) with cols a multiple of 128, or None if impossible."""
    n = x.size
    for c in (2048, 1024, 512, 256, _LANE):
        if n % c == 0:
            return x.reshape(n // c, c)
    return None


def _row_block(rows: int, cols: int, itemsize: int, budget: int) -> int:
    """Rows per block: dtype-aware sublane multiple, bounded by `budget` bytes,
    and sized so non-tiny arrays get >=2 grid blocks (v7x megacore)."""
    sub = 8 * max(1, 4 // itemsize)            # 8 f32, 16 bf16, 32 int8/fp8
    total = rows * cols * itemsize
    if rows <= sub or total <= _SMALL_BYTES:
        return rows                            # single full-extent block
    target = min(budget, (total + 1) // 2)     # at least 2 blocks
    br = max(sub, (target // (cols * itemsize)) // sub * sub)
    return min(br, rows)


def _copy_specs(br: int, cols: int):
    spec = pl.BlockSpec((br, cols), lambda i: (i, 0))
    return spec


# ---------------------------------------------------------------------------
# Pallas copy paths (only used when materialize=True)
# ---------------------------------------------------------------------------
def _tiled_copy_2d(x2d: jax.Array) -> jax.Array:
    rows, cols = x2d.shape
    itemsize = x2d.dtype.itemsize
    br = _row_block(rows, cols, itemsize, _BLOCK_BYTES)
    nbytes = rows * cols * itemsize
    ce = pl.CostEstimate(flops=0, transcendentals=0, bytes_accessed=2 * nbytes)
    spec = _copy_specs(br, cols)
    return pl.pallas_call(
        _copy1_kernel,
        out_shape=jax.ShapeDtypeStruct((rows, cols), x2d.dtype),
        grid=(pl.cdiv(rows, br),),
        in_specs=[spec],
        out_specs=spec,
        compiler_params=pltpu.CompilerParams(dimension_semantics=("parallel",)),
        cost_estimate=ce,
    )(x2d)


def _fused_copy_2d(a2d: jax.Array, b2d: jax.Array):
    """Single launch copying both modalities; requires identical 2-D slabs."""
    rows, cols = a2d.shape
    itemsize = a2d.dtype.itemsize
    # Halve the per-array budget: 2 inputs + 2 outputs, double-buffered,
    # stays <= 8 MiB live VMEM on every generation.
    br = _row_block(rows, cols, itemsize, _BLOCK_BYTES // 2)
    nbytes = 2 * rows * cols * itemsize
    ce = pl.CostEstimate(flops=0, transcendentals=0, bytes_accessed=2 * nbytes)
    spec = _copy_specs(br, cols)
    return pl.pallas_call(
        _copy2_kernel,
        out_shape=(jax.ShapeDtypeStruct(a2d.shape, a2d.dtype),
                   jax.ShapeDtypeStruct(b2d.shape, b2d.dtype)),
        grid=(pl.cdiv(rows, br),),
        in_specs=[spec, spec],
        out_specs=[spec, spec],
        compiler_params=pltpu.CompilerParams(dimension_semantics=("parallel",)),
        cost_estimate=ce,
    )(a2d, b2d)


def _tiled_copy_1d(x1d: jax.Array) -> jax.Array:
    """Fallback for sizes not divisible by 128 (rare, usually tiny arrays)."""
    n = x1d.shape[0]
    itemsize = x1d.dtype.itemsize
    bn = max(_LANE, (_BLOCK_BYTES // itemsize) // _LANE * _LANE)
    nbytes = n * itemsize
    ce = pl.CostEstimate(flops=0, transcendentals=0, bytes_accessed=2 * nbytes)
    if n <= bn:
        # Whole array as one full-extent block (no (8,128) constraint applies).
        return pl.pallas_call(
            _copy1_kernel,
            out_shape=jax.ShapeDtypeStruct((n,), x1d.dtype),
            cost_estimate=ce,
        )(x1d)
    spec = pl.BlockSpec((bn,), lambda i: (i,))
    return pl.pallas_call(
        _copy1_kernel,
        out_shape=jax.ShapeDtypeStruct((n,), x1d.dtype),
        grid=(pl.cdiv(n, bn),),
        in_specs=[spec],
        out_specs=spec,
        compiler_params=pltpu.CompilerParams(dimension_semantics=("parallel",)),
        cost_estimate=ce,
    )(x1d)


def _materialize_one(x: jax.Array) -> jax.Array:
    x2d = _lane_dense_2d(x)
    if x2d is None:
        return _tiled_copy_1d(x.reshape(-1)).reshape(x.shape)
    return _tiled_copy_2d(x2d).reshape(x.shape)


@jax.jit
def _materialize_pair(state: jax.Array, goal: jax.Array):
    s2d, g2d = _lane_dense_2d(state), _lane_dense_2d(goal)
    if (s2d is not None and g2d is not None
            and s2d.shape == g2d.shape and s2d.dtype == g2d.dtype):
        os2d, og2d = _fused_copy_2d(s2d, g2d)
        return os2d.reshape(state.shape), og2d.reshape(goal.shape)
    return _materialize_one(state), _materialize_one(goal)


@jax.jit
def _materialize_single(state: jax.Array):
    return _materialize_one(state)


# ---------------------------------------------------------------------------
# Module
# ---------------------------------------------------------------------------
class NoEncoder:
    """JAX/Pallas port of the PyTorch NoEncoder module (pure pass-through).

    By default this launches NO kernel: the forward pass is a dictionary
    lookup plus device placement, exactly like the PyTorch module.  Set
    ``materialize=True`` only if the caller requires a freshly written buffer;
    that path uses a pipelined Pallas identity-copy kernel.
    """

    def __init__(self, device: str, state_modality: str, goal_modality: str,
                 materialize: bool = False):
        self.device = device                 # kept for API parity; default backend is TPU
        self.state_modality = state_modality
        self.goal_modality = goal_modality
        self.materialize = materialize

    def __call__(self, x: dict):
        state = jnp.asarray(x[self.state_modality])   # == .to(device)
        goal = (jnp.asarray(x[self.goal_modality])
                if self.goal_modality in x else None)

        if not self.materialize:
            # Zero-cost pass-through: no HBM round-trip, no launch overhead.
            return (state, goal)

        if goal is None:
            return (_materialize_single(state), None)
        return _materialize_pair(state, goal)


# ---------------------------------------------------------------------------
# Self-test
# ---------------------------------------------------------------------------
if __name__ == "__main__":
    key = jax.random.PRNGKey(0)
    k_state, k_goal = jax.random.split(key)

    # Small shapes consistent with the module: batch=2, seq=8, hidden=32.
    state = jax.random.normal(k_state, (2, 8, 32), dtype=jnp.float32)
    goal = jax.random.normal(k_goal, (2, 8, 32), dtype=jnp.float32)
    obs = {"state": state, "goal": goal}

    # 1) Default: true pass-through, no Pallas launch (the fast path).
    enc = NoEncoder(device="tpu", state_modality="state", goal_modality="goal")
    out_state, out_goal = enc(obs)
    jax.block_until_ready(out_state)
    jax.block_until_ready(out_goal)
    assert out_state.shape == state.shape and out_state.dtype == state.dtype
    assert out_goal.shape == goal.shape and out_goal.dtype == goal.dtype
    assert jnp.array_equal(out_state, state)
    assert jnp.array_equal(out_goal, goal)

    # 2) Materialized path: single fused Pallas copy kernel for both modalities.
    enc_mat = NoEncoder("tpu", "state", "goal", materialize=True)
    m_state, m_goal = enc_mat(obs)
    jax.block_until_ready(m_state)
    jax.block_until_ready(m_goal)
    assert jnp.array_equal(m_state, state)
    assert jnp.array_equal(m_goal, goal)

    # 3) Missing-goal branch (goal is None).
    s2, g2 = NoEncoder("tpu", "state", "missing", materialize=True)({"state": state})
    jax.block_until_ready(s2)
    assert g2 is None and jnp.array_equal(s2, state)

    # 4) Large slab: lane-dense tiled copy with a multi-block parallel grid.
    big = jax.random.normal(key, (64, 128, 384), dtype=jnp.float32)   # 12 MiB
    b_out, _ = NoEncoder("tpu", "state", "missing", materialize=True)({"state": big})
    jax.block_until_ready(b_out)
    assert jnp.array_equal(b_out, big)

    # 5) Awkward row count: cdiv grid with a partial last block.
    odd_rows = jax.random.normal(key, (40, 72, 96), dtype=jnp.float32)  # ~1.05 MiB
    r_out, _ = NoEncoder("tpu", "state", "missing", materialize=True)({"state": odd_rows})
    jax.block_until_ready(r_out)
    assert jnp.array_equal(r_out, odd_rows)

    # 6) Size not divisible by 128: 1-D full-extent fallback.
    odd = jax.random.normal(key, (3, 7, 5), dtype=jnp.float32)
    o_out, _ = NoEncoder("tpu", "state", "missing", materialize=True)({"state": odd})
    jax.block_until_ready(o_out)
    assert jnp.array_equal(o_out, odd)

    print("KERNEL_OK")
</pallas_src>

<mosaic_0001>
module attributes {stable_mosaic.version = 11 : i64} {
  func.func @_copy2_kernel(%arg0: i32, %arg1: memref<1x512xf32, #tpu.memory_space<vmem>>, %arg2: memref<1x512xf32, #tpu.memory_space<vmem>>, %arg3: memref<1x512xf32, #tpu.memory_space<vmem>>, %arg4: memref<1x512xf32, #tpu.memory_space<vmem>>) attributes {dimension_semantics = [#tpu.dimension_semantics<parallel>], iteration_bounds = array<i64: 1>, scalar_prefetch = 0 : i64, scratch_operands = 0 : i64, tpu.core_type = #tpu.core_type<tc>, window_params = [{transform_indices = @transform_0, window_bounds = array<i64: 1, 512>}, {transform_indices = @transform_1, window_bounds = array<i64: 1, 512>}, {transform_indices = @transform_2, window_bounds = array<i64: 1, 512>}, {transform_indices = @transform_3, window_bounds = array<i64: 1, 512>}]} {
    %c0 = arith.constant 0 : index
    %c0_0 = arith.constant 0 : index
    %0 = vector.load %arg1[%c0, %c0_0] : memref<1x512xf32, #tpu.memory_space<vmem>>, vector<1x512xf32>
    %c0_1 = arith.constant 0 : index
    %c0_2 = arith.constant 0 : index
    %1 = vector.load %arg3[%c0_1, %c0_2] : memref<1x512xf32, #tpu.memory_space<vmem>>, vector<1x512xf32>
    tpu.vector_store %arg3[%c0_1, %c0_2], %0 {strides = array<i32>} : memref<1x512xf32, #tpu.memory_space<vmem>>, vector<1x512xf32>,
    %c0_3 = arith.constant 0 : index
    %c0_4 = arith.constant 0 : index
    %2 = vector.load %arg2[%c0_3, %c0_4] : memref<1x512xf32, #tpu.memory_space<vmem>>, vector<1x512xf32>
    %c0_5 = arith.constant 0 : index
    %c0_6 = arith.constant 0 : index
    %3 = vector.load %arg4[%c0_5, %c0_6] : memref<1x512xf32, #tpu.memory_space<vmem>>, vector<1x512xf32>
    tpu.vector_store %arg4[%c0_5, %c0_6], %2 {strides = array<i32>} : memref<1x512xf32, #tpu.memory_space<vmem>>, vector<1x512xf32>,
    return
  }
  func.func @transform_0(%arg0: i32) -> (i32, i32) {
    %c0_i32 = arith.constant 0 : i32
    %c0_i32_0 = arith.constant 0 : i32
    return %arg0, %c0_i32 : i32, i32
  }
  func.func @transform_1(%arg0: i32) -> (i32, i32) {
    %c0_i32 = arith.constant 0 : i32
    %c0_i32_0 = arith.constant 0 : i32
    return %arg0, %c0_i32 : i32, i32
  }
  func.func @transform_2(%arg0: i32) -> (i32, i32) {
    %c0_i32 = arith.constant 0 : i32
    %c0_i32_0 = arith.constant 0 : i32
    return %arg0, %c0_i32 : i32, i32
  }
  func.func @transform_3(%arg0: i32) -> (i32, i32) {
    %c0_i32 = arith.constant 0 : i32
    %c0_i32_0 = arith.constant 0 : i32
    return %arg0, %c0_i32 : i32, i32
  }
}

</mosaic_0001>

<bundles_post_ra>
// kernel: _materialize_pair.1
= control target key start
LH: loop header
LB: loop body
LE: loop exit
PB: predicated region body
PF: predicated region fallthrough
CT: control target
= control target key end

     0   :  { %v14_v0 = vlaneseq  ;;  %s61_s0 = inlined_call_operand.vmem [shape: f32[1,512], index: 0, kind: input, shape index: {}]   ;;  %s62_s2 = inlined_call_operand.vmem [shape: f32[1,512], index: 2, kind: output, shape index: {0}]   ;;  %s63_s1 = inlined_call_operand.vmem [shape: f32[1,512], index: 1, kind: input, shape index: {}]   ;;  %s64_s3 = inlined_call_operand.vmem [shape: f32[1,512], index: 3, kind: output, shape index: {1}]  }
   0x1   :  { %v13_v1 = vld [vmem:[%s61_s0] sm:$0xf] }
   0x2   :  { %v19_v2 = vld [vmem:[%s63_s1] sm:$0xf]  ;;  %vm16_vm0 = vcmp.lt.s32.totalorder %v14_v0, 512 }
   0x3   :  { %18 = vst.msk [vmem:[%s62_s2] sm:$0xf] %vm16_vm0, %v13_v1  ;;  %20 = vst.msk [vmem:[%s64_s3] sm:$0xf] %vm16_vm0, %v19_v2 }

</bundles_post_ra>
